<compile_context>
chip_gen: v5e
topology: v5e:2x2
jax: 0.10.0
libtpu: 0.0.40
codegen_flags: <defaults>
</compile_context>

<pallas_src>
import functools

import jax
import jax.numpy as jnp
from jax import lax
from jax.experimental import pallas as pl
from jax.experimental.pallas import tpu as pltpu


# ---------------------------------------------------------------------------
# Path A kernel: whole table resident in VMEM, one-hot gather on the MXU.
# ---------------------------------------------------------------------------
def _onehot_gather_kernel(labels_ref,   # VMEM (TB, 1) int32
                          table_ref,    # VMEM (V, D)
                          out_ref):     # VMEM (TB, D)
    tb = labels_ref.shape[0]
    v = table_ref.shape[0]
    labs = labels_ref[...]                                     # (TB, 1)
    cols = lax.broadcasted_iota(jnp.int32, (tb, v), 1)         # (TB, V)
    onehot = (labs == cols).astype(table_ref.dtype)            # (TB, V) of 0/1
    out_ref[...] = jnp.dot(
        onehot, table_ref[...], preferred_element_type=jnp.float32
    ).astype(out_ref.dtype)


# ---------------------------------------------------------------------------
# Path B kernel: HBM-resident table, per-row DMA straight into the output block.
# ---------------------------------------------------------------------------
def _hbm_row_gather_kernel(labels_ref,  # SMEM (B,) int32   (scalar prefetch)
                           table_ref,   # HBM  (V, D)       (memory_space=pl.ANY)
                           out_ref,     # VMEM (TB, D)      (pipelined output block)
                           sem,         # DMA semaphore (1,), shared by all rows
                           *, batch, tile):
    base = pl.program_id(0) * tile

    def issue(r, carry):
        # Clamp covers padded rows of a ragged last tile (writeback masks them).
        b = jnp.minimum(base + r, batch - 1)
        lab = labels_ref[b]                        # scalar SMEM read (before any wait)
        pltpu.make_async_copy(table_ref.at[pl.ds(lab, 1), :],
                              out_ref.at[pl.ds(r, 1), :],
                              sem.at[0]).start()
        return carry

    def wait(r, carry):
        # Wait descriptor only needs matching shape/dtype for the byte count.
        pltpu.make_async_copy(table_ref.at[pl.ds(0, 1), :],
                              out_ref.at[pl.ds(r, 1), :],
                              sem.at[0]).wait()
        return carry

    if tile <= 32:
        # Small tile: full static unroll is cheap and gives LLO full visibility.
        for r in range(tile):
            issue(r, 0)
        for r in range(tile):
            wait(r, 0)
    else:
        # Large tile: bounded unroll avoids code/compile blowup; DMA descriptors
        # issue ~1/cycle through the misc slot regardless of unrolling.
        unroll = 8
        lax.fori_loop(0, tile, issue, 0, unroll=unroll)
        lax.fori_loop(0, tile, wait, 0, unroll=unroll)


# ---------------------------------------------------------------------------
# Wrapper: eval-mode LabelEmbedding.forward (labels (B,) int -> (B, D) rows).
# ---------------------------------------------------------------------------
def label_embedding(labels, table, *, table_vmem_limit_bytes=4 * 1024 * 1024):
    """labels (B,) int -> (B, D) rows of `table` (output dtype == table dtype).

    Note: out-of-range labels are clamped to [0, V-1] instead of raising like
    nn.Embedding (avoids an out-of-bounds DMA on device).
    """
    B = int(labels.shape[0])
    V, D = (int(s) for s in table.shape)
    itemsize = jnp.dtype(table.dtype).itemsize
    labels_i32 = jnp.clip(labels.astype(jnp.int32), 0, V - 1)

    # NOTE: production models should keep D a multiple of 128 (lane-dense output).
    if V * D * itemsize <= table_vmem_limit_bytes:
        # ---- Path A: small table, stream to VMEM + one-hot MXU gather ----
        TB = B if B <= 512 else 512
        grid = (pl.cdiv(B, TB),)
        cost = pl.CostEstimate(
            flops=2 * B * V * D,
            transcendentals=0,
            bytes_accessed=(V * D + B * D) * itemsize + B * 4,
        )
        grid_spec = pltpu.PrefetchScalarGridSpec(
            num_scalar_prefetch=0,
            grid=grid,
            in_specs=[pl.BlockSpec((TB, 1), lambda i: (i, 0)),
                      pl.BlockSpec((V, D), lambda i: (0, 0))],
            out_specs=pl.BlockSpec((TB, D), lambda i: (i, 0)),
        )
        return pl.pallas_call(
            _onehot_gather_kernel,
            out_shape=jax.ShapeDtypeStruct((B, D), table.dtype),
            grid_spec=grid_spec,
            compiler_params=pltpu.CompilerParams(
                dimension_semantics=("parallel",)),
            cost_estimate=cost,
        )(labels_i32.reshape(B, 1), table)

    # ---- Path B: large table, HBM row-gather DMAs into the output block ----
    TB = B if B <= 256 else 256
    grid = (pl.cdiv(B, TB),)
    cost = pl.CostEstimate(
        flops=0,
        transcendentals=0,
        bytes_accessed=2 * B * D * itemsize + B * 4,
    )
    kernel = functools.partial(_hbm_row_gather_kernel, batch=B, tile=TB)
    grid_spec = pltpu.PrefetchScalarGridSpec(
        num_scalar_prefetch=1,
        grid=grid,
        in_specs=[pl.BlockSpec(memory_space=pl.ANY)],      # table stays in HBM
        out_specs=pl.BlockSpec((TB, D), lambda i, labs: (i, 0)),
        scratch_shapes=[pltpu.SemaphoreType.DMA((1,))],    # single shared DMA sem
    )
    return pl.pallas_call(
        kernel,
        out_shape=jax.ShapeDtypeStruct((B, D), table.dtype),
        grid_spec=grid_spec,
        compiler_params=pltpu.CompilerParams(
            dimension_semantics=("parallel",)),
        cost_estimate=cost,
    )(labels_i32, table)


def token_drop(labels, num_classes, dropout_prob, force_drop_ids=None, rng_key=None):
    """JAX port of LabelEmbedding.token_drop (runs outside the kernel, exactly as
    the PyTorch module substitutes labels before the embedding lookup)."""
    if force_drop_ids is None:
        drop_ids = jax.random.uniform(rng_key, labels.shape) < dropout_prob
    else:
        drop_ids = (force_drop_ids == 1)
    return jnp.where(drop_ids, num_classes, labels)


def _reference(labels, table):
    return table[labels]


if __name__ == "__main__":
    key = jax.random.PRNGKey(0)
    k_tab, k_lab, k_tab2, k_lab2 = jax.random.split(key, 4)

    # ----- Test 1: module-consistent tiny shapes, VMEM (one-hot MXU) path -----
    num_classes, hidden_size, dropout_prob, B = 10, 32, 0.1, 8
    V = num_classes + 1                       # use_cfg_embedding = dropout_prob > 0
    table = jax.random.normal(k_tab, (V, hidden_size), jnp.float32)
    labels = jax.random.randint(k_lab, (B,), 0, num_classes, jnp.int32)

    out = jax.block_until_ready(label_embedding(labels, table))
    assert out.shape == (B, hidden_size)
    assert jnp.array_equal(out, _reference(labels, table)), "VMEM path mismatch"

    # forward(labels, force_drop_ids=...): label substitution then lookup (CFG path).
    force_drop_ids = (jnp.arange(B) % 2).astype(jnp.int32)
    dropped = token_drop(labels, num_classes, dropout_prob,
                         force_drop_ids=force_drop_ids)
    out_cfg = jax.block_until_ready(label_embedding(dropped, table))
    ref_cfg = _reference(jnp.where(force_drop_ids == 1, num_classes, labels), table)
    assert jnp.array_equal(out_cfg, ref_cfg), "force_drop_ids path mismatch"

    # ----- Test 2: force the HBM row-gather path on the same tiny shapes -----
    out_hbm = jax.block_until_ready(
        label_embedding(labels, table, table_vmem_limit_bytes=0))
    assert jnp.array_equal(out_hbm, _reference(labels, table)), "HBM path mismatch"

    # ----- Test 3: HBM path, bf16 table, lane-dense D, B>32 (fori_loop path) -----
    V2, D2, B2 = 300, 128, 40
    table2 = jax.random.normal(k_tab2, (V2, D2), jnp.float32).astype(jnp.bfloat16)
    labels2 = jax.random.randint(k_lab2, (B2,), 0, V2, jnp.int32)
    out2 = jax.block_until_ready(
        label_embedding(labels2, table2, table_vmem_limit_bytes=0))
    assert jnp.array_equal(out2, _reference(labels2, table2)), "bf16 HBM path mismatch"
    # Same shapes through the VMEM one-hot path (exact row selection, also bf16).
    out2_v = jax.block_until_ready(label_embedding(labels2, table2))
    assert jnp.array_equal(out2_v, _reference(labels2, table2)), "bf16 VMEM path mismatch"

    print("KERNEL_OK")
</pallas_src>

<mosaic_0001>
module attributes {stable_mosaic.version = 11 : i64} {
  func.func @_onehot_gather_kernel(%arg0: i32, %arg1: memref<8x1xi32, #tpu.memory_space<vmem>>, %arg2: memref<11x32xf32, #tpu.memory_space<vmem>>, %arg3: memref<8x32xf32, #tpu.memory_space<vmem>>) attributes {dimension_semantics = [#tpu.dimension_semantics<parallel>], iteration_bounds = array<i64: 1>, scalar_prefetch = 0 : i64, scratch_operands = 0 : i64, tpu.core_type = #tpu.core_type<tc>, window_params = [{transform_indices = @transform_0, window_bounds = array<i64: 8, 1>}, {pipeline_mode = #tpu.pipeline_mode<synchronous>, transform_indices = @transform_1, window_bounds = array<i64: 11, 32>}, {transform_indices = @transform_2, window_bounds = array<i64: 8, 32>}]} {
    %c0 = arith.constant 0 : index
    %c0_0 = arith.constant 0 : index
    %0 = vector.load %arg1[%c0, %c0_0] : memref<8x1xi32, #tpu.memory_space<vmem>>, vector<8x1xi32>
    %1 = tpu.iota {dimensions = array<i32: 1>} : vector<8x11xi32>
    %2 = vector.broadcast %0 : vector<8x1xi32> to vector<8x11xi32>
    %3 = arith.cmpi eq, %2, %1 : vector<8x11xi32>
    %4 = arith.extui %3 : vector<8x11xi1> to vector<8x11xi32>
    %5 = arith.sitofp %4 : vector<8x11xi32> to vector<8x11xf32>
    %c0_1 = arith.constant 0 : index
    %c0_2 = arith.constant 0 : index
    %6 = vector.load %arg2[%c0_1, %c0_2] : memref<11x32xf32, #tpu.memory_space<vmem>>, vector<11x32xf32>
    %cst = arith.constant dense<0.000000e+00> : vector<8x32xf32>
    %7 = tpu.matmul %5, %6, %cst {dimension_numbers = #tpu.dot_dimension_numbers<[1], [0], [0], [1], [0, 0, 1, 1], [], []>} : vector<8x11xf32>, vector<11x32xf32>, vector<8x32xf32> -> vector<8x32xf32>
    %c0_3 = arith.constant 0 : index
    %c0_4 = arith.constant 0 : index
    %8 = vector.load %arg3[%c0_3, %c0_4] : memref<8x32xf32, #tpu.memory_space<vmem>>, vector<8x32xf32>
    tpu.vector_store %arg3[%c0_3, %c0_4], %7 {strides = array<i32>} : memref<8x32xf32, #tpu.memory_space<vmem>>, vector<8x32xf32>,
    return
  }
  func.func @transform_0(%arg0: i32) -> (i32, i32) {
    %c0_i32 = arith.constant 0 : i32
    %c0_i32_0 = arith.constant 0 : i32
    return %arg0, %c0_i32 : i32, i32
  }
  func.func @transform_1(%arg0: i32) -> (i32, i32) {
    %c0_i32 = arith.constant 0 : i32
    %c0_i32_0 = arith.constant 0 : i32
    %c0_i32_1 = arith.constant 0 : i32
    return %c0_i32, %c0_i32_0 : i32, i32
  }
  func.func @transform_2(%arg0: i32) -> (i32, i32) {
    %c0_i32 = arith.constant 0 : i32
    %c0_i32_0 = arith.constant 0 : i32
    return %arg0, %c0_i32 : i32, i32
  }
}

</mosaic_0001>

<bundles_post_ra>
// kernel: tpu_custom_call.1
= control target key start
LH: loop header
LB: loop body
LE: loop exit
PB: predicated region body
PF: predicated region fallthrough
CT: control target
= control target key end

     0   :  { %7 = vsyncpa [#allocation3], 0  ;;  %s178_s0 = inlined_call_operand.vmem [shape: s32[8,1], index: 0, kind: input, shape index: {}]   ;;  %s179_s1 = inlined_call_operand.hbm [shape: f32[11,32], index: 1, kind: input, shape index: {}]   ;;  %s180_s2 = inlined_call_operand.hbm [shape: f32[8,32], index: 2, kind: output, shape index: {}]  }
   0x1   :  { %8 = vsyncpa [#allocation4], 0  ;;  %s15_s11 = sshll.u32 %s179_s1, 4  ;;  %s148_s12 = smov [#allocation2]   ;;  %s16_s11 = int_to_ptr.hbm [resolvable:$true] %s15_s11 }
   0x2   :  { %s17_s13 = sshll.u32 %s148_s12, 4  ;;  %s149_s14 = smov 128   ;;  %s18_s13 = int_to_ptr.vmem [resolvable:$true] %s17_s13 }
   0x3   :  { %s150_s15 = smov 8  }
   0x4   :  { %23 = dma.hbm_to_vmem [thread:$0]  %s16_s11, 256, %s18_s13, [#allocation3], %s149_s14, %s149_s14, %s150_s15  }
   0x5   :  { %144 = dma.done.wait [#allocation3], 256  }
   0x6   :  { %145 = vsyncadd [#allocation3], 4294967040  ;;  %v151_v0 = vmov 0   ;;  %vm43_vm0 = vcmask 1042432   ;;  %v28_v1 = vld [vmem:[%s178_s0] sm:$0xff]  ;;  %v29_v4 = vlaneseq  ;;  %vm39_vm1 = vcmask 89088  }
   0x7   :  { %95 = vset.pattern.permute.xlu0 %v151_v0  ;;  %v38_v2 = vld [vmem:[#allocation2 + $0x8] sm:$0x7]  ;;  %v37_v3 = vld [vmem:[#allocation2] sm:$0xff]  ;;  %v152_v7 = vmov 0.0   ;;  %s153_s1 = smov [#allocation5]   ;;  %s76_s21 = sshll.u32 %s180_s2, 4  ;;  %s77_s21 = int_to_ptr.hbm [resolvable:$true] %s76_s21 }
   0x8   :  { %32 = vperm.xlu0 %95, %v28_v1   ;;  %87 = vmatpush.msk.msra.mxu0 %vm43_vm0, %v38_v2  ;;  %v30_v5 = vand.u32 127, %v29_v4  ;;  %s74_s18 = sshll.u32 %s153_s1, 4  ;;  %vm67_vm3 = vcmask 261120   ;;  %s75_s18 = int_to_ptr.vmem [resolvable:$true] %s74_s18 }
   0xa   :  { %62 = vmatpush.msra.mxu0 %v37_v3 }
  0x7a   :  { %v33_v6 = vpop.permute.xlu0 %32 }
  0x7b   :  { %vm34_vm2 = vcmp.eq.s32.totalorder %v33_v6, %v30_v5 }
  0x7c   :  { %v86_v8 = vsel %vm34_vm2, 1.0, %v152_v7 }
  0x7d   :  { %88 = vmatmul.msk.f32.vlgmr.msra.gmra.mxu0 %vm39_vm1, %v86_v8 }
  0xfa   :  { %v64_v9 = vpop.f32.mrf.mxu0 }
  0xfb   :  { %68 = vst.msk [vmem:[#allocation5] sm:$0xff] %vm67_vm3, %v64_v9 }
  0xfc   :  { %79 = dma.vmem_to_hbm [thread:$0]  %s75_s18, 128, %s77_s21, [#allocation4]  }
  0xfd   :  { %146 = dma.done.wait [#allocation4], 128  }
  0xfe   :  { %147 = vsyncadd [#allocation4], 4294967168 }
  0xff   :  { %84 = vsyncpa [#allocation3], 1 }
 0x100   :  { %85 = vsyncpa [#allocation4], 1 }

</bundles_post_ra>
